<compile_context>
chip_gen: v6e
topology: v6e:2x2x1
jax: 0.10.0
libtpu: 0.0.40
codegen_flags: <defaults>
</compile_context>

<pallas_src>
import functools
import math

import jax
import jax.numpy as jnp
from jax import lax
from jax.experimental import pallas as pl
from jax.experimental.pallas import tpu as pltpu

_BF16 = jnp.bfloat16
_VMEM_LIMIT = 48 * 1024 * 1024   # above v5e(16M)/v6e(32M) scoped defaults, < v7x physical


def _row_tile(n):
    """Row tile: full slab when small, else 512 (multiple of 256 for v6e MXU)."""
    return n if n <= 512 else 512


def _cparams():
    return pltpu.CompilerParams(dimension_semantics=("parallel",),
                                vmem_limit_bytes=_VMEM_LIMIT)


# ----------------------------- Pallas kernels ------------------------------ #

def _qkv_proj_kernel(x_ref, pos_ref, wqk_ref, bqk_ref, wv_ref, bv_ref,
                     q_ref, kv_ref, *, d):
    """q = (x+pos)@[wq|wk][:, :d], kv = [(x+pos)@[wq|wk][:, d:] | x@wv]."""
    x = x_ref[...]
    xp = (x + pos_ref[...]).astype(_BF16)
    qk = jnp.dot(xp, wqk_ref[...], preferred_element_type=jnp.float32) + bqk_ref[...]
    v = jnp.dot(x.astype(_BF16), wv_ref[...],
                preferred_element_type=jnp.float32) + bv_ref[...]
    q_ref[...] = qk[:, :d]
    kv_ref[...] = jnp.concatenate([qk[:, d:], v], axis=-1)


def qkv_proj(x, pos, wqk, bqk, wv, bv):
    """x,pos:(N,D) -> q:(N,D), kv:(N,2D). Fused QKV projection + pos add."""
    n, d = x.shape
    tm = _row_tile(n)
    return pl.pallas_call(
        functools.partial(_qkv_proj_kernel, d=d),
        grid=(pl.cdiv(n, tm),),
        in_specs=[pl.BlockSpec((tm, d), lambda i: (i, 0)),
                  pl.BlockSpec((tm, d), lambda i: (i, 0)),
                  pl.BlockSpec((d, 2 * d), lambda i: (0, 0)),
                  pl.BlockSpec((1, 2 * d), lambda i: (0, 0)),
                  pl.BlockSpec((d, d), lambda i: (0, 0)),
                  pl.BlockSpec((1, d), lambda i: (0, 0))],
        out_specs=[pl.BlockSpec((tm, d), lambda i: (i, 0)),
                   pl.BlockSpec((tm, 2 * d), lambda i: (i, 0))],
        out_shape=(jax.ShapeDtypeStruct((n, d), jnp.float32),
                   jax.ShapeDtypeStruct((n, 2 * d), jnp.float32)),
        compiler_params=_cparams(),
    )(x, pos, wqk, bqk, wv, bv)


def _kv_proj_kernel(x_ref, pos_ref, wk_ref, bk_ref, wv_ref, bv_ref, kv_ref):
    """kv = [(x+pos)@wk | x@wv] for cross-attention memory."""
    x = x_ref[...]
    xp = (x + pos_ref[...]).astype(_BF16)
    k = jnp.dot(xp, wk_ref[...], preferred_element_type=jnp.float32) + bk_ref[...]
    v = jnp.dot(x.astype(_BF16), wv_ref[...],
                preferred_element_type=jnp.float32) + bv_ref[...]
    kv_ref[...] = jnp.concatenate([k, v], axis=-1)


def kv_proj(x, pos, wk, bk, wv, bv):
    n, d = x.shape
    tm = _row_tile(n)
    return pl.pallas_call(
        _kv_proj_kernel,
        grid=(pl.cdiv(n, tm),),
        in_specs=[pl.BlockSpec((tm, d), lambda i: (i, 0)),
                  pl.BlockSpec((tm, d), lambda i: (i, 0)),
                  pl.BlockSpec((d, d), lambda i: (0, 0)),
                  pl.BlockSpec((1, d), lambda i: (0, 0)),
                  pl.BlockSpec((d, d), lambda i: (0, 0)),
                  pl.BlockSpec((1, d), lambda i: (0, 0))],
        out_specs=pl.BlockSpec((tm, 2 * d), lambda i: (i, 0)),
        out_shape=jax.ShapeDtypeStruct((n, 2 * d), jnp.float32),
        compiler_params=_cparams(),
    )(x, pos, wk, bk, wv, bv)


def _pos_proj_kernel(x_ref, pos_ref, w_ref, b_ref, o_ref):
    """o = (x + pos) @ w + b  (used for cross-attention query)."""
    xp = (x_ref[...] + pos_ref[...]).astype(_BF16)
    o_ref[...] = jnp.dot(xp, w_ref[...],
                         preferred_element_type=jnp.float32) + b_ref[...]


def pos_proj(x, pos, w, b):
    n, d = x.shape
    dout = w.shape[1]
    tm = _row_tile(n)
    return pl.pallas_call(
        _pos_proj_kernel,
        grid=(pl.cdiv(n, tm),),
        in_specs=[pl.BlockSpec((tm, d), lambda i: (i, 0)),
                  pl.BlockSpec((tm, d), lambda i: (i, 0)),
                  pl.BlockSpec((d, dout), lambda i: (0, 0)),
                  pl.BlockSpec((1, dout), lambda i: (0, 0))],
        out_specs=pl.BlockSpec((tm, dout), lambda i: (i, 0)),
        out_shape=jax.ShapeDtypeStruct((n, dout), jnp.float32),
        compiler_params=_cparams(),
    )(x, pos, w, b)


def _mha_kernel(q_ref, kv_ref, o_ref, *, nhead, dh, d):
    """Per-batch multi-head attention. q:(1,Lq,D), kv:(1,Lk,2D) -> (1,Lq,D).
    Scale is pre-folded into the q-projection weights."""
    qall = q_ref[0]        # (Lq, D)
    kv = kv_ref[0]         # (Lk, 2D)
    outs = []
    for h in range(nhead):  # static unrolled head loop
        q = qall[:, h * dh:(h + 1) * dh].astype(_BF16)
        k = kv[:, h * dh:(h + 1) * dh].astype(_BF16)
        v = kv[:, d + h * dh:d + (h + 1) * dh].astype(_BF16)
        # s = q @ k^T  (contract head dim, no explicit transpose)
        s = lax.dot_general(q, k, (((1,), (1,)), ((), ())),
                            preferred_element_type=jnp.float32)
        s = s - jnp.max(s, axis=-1, keepdims=True)
        p = jnp.exp(s)
        p = p * pl.reciprocal(jnp.sum(p, axis=-1, keepdims=True), approx=True)
        outs.append(jnp.dot(p.astype(_BF16), v,
                            preferred_element_type=jnp.float32))
    # single lane-dense (Lq, D) store
    o_ref[0] = jnp.concatenate(outs, axis=-1)


def mha(q, kv, nhead):
    """q:(B,Lq,D), kv:(B,Lk,2D) -> (B,Lq,D)."""
    b, lq, d = q.shape
    lk = kv.shape[1]
    dh = d // nhead
    # TODO(synk): for long sequences (real DETR S~600-1300) tile Lk with an
    # online-softmax accumulator instead of materializing the full score matrix.
    return pl.pallas_call(
        functools.partial(_mha_kernel, nhead=nhead, dh=dh, d=d),
        grid=(b,),
        in_specs=[pl.BlockSpec((1, lq, d), lambda i: (i, 0, 0)),
                  pl.BlockSpec((1, lk, 2 * d), lambda i: (i, 0, 0))],
        out_specs=pl.BlockSpec((1, lq, d), lambda i: (i, 0, 0)),
        out_shape=jax.ShapeDtypeStruct((b, lq, d), jnp.float32),
        compiler_params=_cparams(),
    )(q, kv)


def _proj_add_ln_kernel(x_ref, res_ref, w_ref, b_ref, g_ref, bb_ref, o_ref, *, eps):
    """LayerNorm(residual + x @ w + b)."""
    y = res_ref[...] + jnp.dot(x_ref[...].astype(_BF16), w_ref[...],
                               preferred_element_type=jnp.float32) + b_ref[...]
    mu = jnp.mean(y, axis=-1, keepdims=True)
    var = jnp.mean((y - mu) ** 2, axis=-1, keepdims=True)
    o_ref[...] = (y - mu) * lax.rsqrt(var + eps) * g_ref[...] + bb_ref[...]


def proj_add_ln(x, residual, w, b, gamma, beta, eps=1e-5):
    n, d = x.shape
    tm = _row_tile(n)
    return pl.pallas_call(
        functools.partial(_proj_add_ln_kernel, eps=eps),
        grid=(pl.cdiv(n, tm),),
        in_specs=[pl.BlockSpec((tm, d), lambda i: (i, 0)),
                  pl.BlockSpec((tm, d), lambda i: (i, 0)),
                  pl.BlockSpec((d, d), lambda i: (0, 0)),
                  pl.BlockSpec((1, d), lambda i: (0, 0)),
                  pl.BlockSpec((1, d), lambda i: (0, 0)),
                  pl.BlockSpec((1, d), lambda i: (0, 0))],
        out_specs=pl.BlockSpec((tm, d), lambda i: (i, 0)),
        out_shape=jax.ShapeDtypeStruct((n, d), jnp.float32),
        compiler_params=_cparams(),
    )(x, residual, w, b, gamma, beta)


def _ffn_add_ln_kernel(x_ref, w1_ref, b1_ref, w2_ref, b2_ref, g_ref, b_ref,
                       o_ref, *, eps):
    """LayerNorm(x + linear2(relu(linear1(x))))."""
    x = x_ref[...]
    h = jnp.dot(x.astype(_BF16), w1_ref[...],
                preferred_element_type=jnp.float32) + b1_ref[...]
    h = jnp.maximum(h, 0.0).astype(_BF16)               # relu
    y = x + jnp.dot(h, w2_ref[...],
                    preferred_element_type=jnp.float32) + b2_ref[...]
    mu = jnp.mean(y, axis=-1, keepdims=True)
    var = jnp.mean((y - mu) ** 2, axis=-1, keepdims=True)
    o_ref[...] = (y - mu) * lax.rsqrt(var + eps) * g_ref[...] + b_ref[...]


def ffn_add_ln(x, w1, b1, w2, b2, gamma, beta, eps=1e-5):
    n, d = x.shape
    f = w1.shape[1]
    tm = _row_tile(n)
    return pl.pallas_call(
        functools.partial(_ffn_add_ln_kernel, eps=eps),
        grid=(pl.cdiv(n, tm),),
        in_specs=[pl.BlockSpec((tm, d), lambda i: (i, 0)),
                  pl.BlockSpec((d, f), lambda i: (0, 0)),
                  pl.BlockSpec((1, f), lambda i: (0, 0)),
                  pl.BlockSpec((f, d), lambda i: (0, 0)),
                  pl.BlockSpec((1, d), lambda i: (0, 0)),
                  pl.BlockSpec((1, d), lambda i: (0, 0)),
                  pl.BlockSpec((1, d), lambda i: (0, 0))],
        out_specs=pl.BlockSpec((tm, d), lambda i: (i, 0)),
        out_shape=jax.ShapeDtypeStruct((n, d), jnp.float32),
        compiler_params=_cparams(),
    )(x, w1, b1, w2, b2, gamma, beta)


def _ln_kernel(x_ref, g_ref, b_ref, o_ref, *, eps):
    x = x_ref[...]
    mu = jnp.mean(x, axis=-1, keepdims=True)
    var = jnp.mean((x - mu) ** 2, axis=-1, keepdims=True)
    o_ref[...] = (x - mu) * lax.rsqrt(var + eps) * g_ref[...] + b_ref[...]


def layer_norm(x, gamma, beta, eps=1e-5):
    n, d = x.shape
    tm = _row_tile(n)
    return pl.pallas_call(
        functools.partial(_ln_kernel, eps=eps),
        grid=(pl.cdiv(n, tm),),
        in_specs=[pl.BlockSpec((tm, d), lambda i: (i, 0)),
                  pl.BlockSpec((1, d), lambda i: (0, 0)),
                  pl.BlockSpec((1, d), lambda i: (0, 0))],
        out_specs=pl.BlockSpec((tm, d), lambda i: (i, 0)),
        out_shape=jax.ShapeDtypeStruct((n, d), jnp.float32),
        compiler_params=_cparams(),
    )(x, gamma, beta)


# ------------------------- Transformer building blocks --------------------- #

def encoder_layer_fwd(src, pos, p, nhead):
    """TransformerEncoderLayer.forward_post (dropout = identity)."""
    b, s, d = src.shape
    x2 = src.reshape(b * s, d)
    p2 = pos.reshape(b * s, d)
    q, kv = qkv_proj(x2, p2, p["sa_wqk"], p["sa_bqk"], p["sa_wv"], p["sa_bv"])
    attn = mha(q.reshape(b, s, d), kv.reshape(b, s, 2 * d), nhead)
    x = proj_add_ln(attn.reshape(b * s, d), x2, p["sa_wo"], p["sa_bo"],
                    p["ln1_g"], p["ln1_b"])
    x = ffn_add_ln(x, p["w1"], p["b1"], p["w2"], p["b2"], p["ln2_g"], p["ln2_b"])
    return x.reshape(b, s, d)


def decoder_layer_fwd(tgt, memory, pos, query_pos, p, nhead):
    """TransformerDecoderLayer.forward_post (dropout = identity)."""
    b, nq, d = tgt.shape
    s = memory.shape[1]
    t2 = tgt.reshape(b * nq, d)
    qp2 = query_pos.reshape(b * nq, d)
    # self-attention
    q, kv = qkv_proj(t2, qp2, p["sa_wqk"], p["sa_bqk"], p["sa_wv"], p["sa_bv"])
    attn = mha(q.reshape(b, nq, d), kv.reshape(b, nq, 2 * d), nhead)
    t = proj_add_ln(attn.reshape(b * nq, d), t2, p["sa_wo"], p["sa_bo"],
                    p["ln1_g"], p["ln1_b"])
    # cross-attention
    q = pos_proj(t, qp2, p["ca_wq"], p["ca_bq"])
    kv = kv_proj(memory.reshape(b * s, d), pos.reshape(b * s, d),
                 p["ca_wk"], p["ca_bk"], p["ca_wv"], p["ca_bv"])
    attn = mha(q.reshape(b, nq, d), kv.reshape(b, s, 2 * d), nhead)
    t = proj_add_ln(attn.reshape(b * nq, d), t, p["ca_wo"], p["ca_bo"],
                    p["ln2_g"], p["ln2_b"])
    # feed-forward
    t = ffn_add_ln(t, p["w1"], p["b1"], p["w2"], p["b2"], p["ln3_g"], p["ln3_b"])
    return t.reshape(b, nq, d)


def transformer_forward(src, mask, query_embed, pos_embed, params, nhead,
                        encoder_only=False):
    """Mirrors Transformer.forward (normalize_before=False, no intermediates)."""
    bs, c, h, w = src.shape
    s = h * w
    src_bsd = src.reshape(bs, c, s).transpose(0, 2, 1)        # (B, S, D)
    pos_bsd = pos_embed.reshape(bs, c, s).transpose(0, 2, 1)  # (B, S, D)
    nq = query_embed.shape[0]
    query_pos = jnp.broadcast_to(query_embed[None, :, :], (bs, nq, c))
    # TODO(synk): key_padding_mask path (mask is not None) not implemented; caller passes None.
    tgt = jnp.zeros((bs, nq, c), jnp.float32)

    memory = src_bsd
    for lp in params["encoder_layers"]:
        memory = encoder_layer_fwd(memory, pos_bsd, lp, nhead)
    # encoder_norm is None when normalize_before=False.

    if encoder_only:
        return memory.transpose(0, 2, 1).reshape(bs, c, h, w)

    out = tgt
    for lp in params["decoder_layers"]:
        out = decoder_layer_fwd(out, memory, pos_bsd, query_pos, lp, nhead)

    out = layer_norm(out.reshape(bs * nq, c),
                     params["dec_norm_g"], params["dec_norm_b"])
    # torch: hs.unsqueeze(0).transpose(1, 2) -> (1, bs, nq, d); batch-first already.
    return out.reshape(bs, nq, c)[None]


# ------------------------------ parameter init ----------------------------- #

def _xavier(key, shape):
    fan_in, fan_out = shape
    lim = math.sqrt(6.0 / (fan_in + fan_out))
    return jax.random.uniform(key, shape, jnp.float32, -lim, lim)


def init_self_attn(key, d, nhead):
    ks = jax.random.split(key, 4)
    scale = 1.0 / math.sqrt(d // nhead)
    wq = _xavier(ks[0], (d, d)) * scale          # fold 1/sqrt(dh) into wq
    wk = _xavier(ks[1], (d, d))
    return dict(
        sa_wqk=jnp.concatenate([wq, wk], axis=1).astype(_BF16),
        sa_bqk=jnp.zeros((1, 2 * d), jnp.float32),
        sa_wv=_xavier(ks[2], (d, d)).astype(_BF16),
        sa_bv=jnp.zeros((1, d), jnp.float32),
        sa_wo=_xavier(ks[3], (d, d)).astype(_BF16),
        sa_bo=jnp.zeros((1, d), jnp.float32))


def init_cross_attn(key, d, nhead):
    ks = jax.random.split(key, 4)
    scale = 1.0 / math.sqrt(d // nhead)
    return dict(
        ca_wq=(_xavier(ks[0], (d, d)) * scale).astype(_BF16),
        ca_bq=jnp.zeros((1, d), jnp.float32),
        ca_wk=_xavier(ks[1], (d, d)).astype(_BF16),
        ca_bk=jnp.zeros((1, d), jnp.float32),
        ca_wv=_xavier(ks[2], (d, d)).astype(_BF16),
        ca_bv=jnp.zeros((1, d), jnp.float32),
        ca_wo=_xavier(ks[3], (d, d)).astype(_BF16),
        ca_bo=jnp.zeros((1, d), jnp.float32))


def _ffn_params(key, d, ff):
    k1, k2 = jax.random.split(key, 2)
    return dict(w1=_xavier(k1, (d, ff)).astype(_BF16),
                b1=jnp.zeros((1, ff), jnp.float32),
                w2=_xavier(k2, (ff, d)).astype(_BF16),
                b2=jnp.zeros((1, d), jnp.float32))


def init_encoder_layer(key, d, ff, nhead):
    k1, k2 = jax.random.split(key, 2)
    p = dict(**init_self_attn(k1, d, nhead), **_ffn_params(k2, d, ff))
    for i in (1, 2):
        p[f"ln{i}_g"] = jnp.ones((1, d), jnp.float32)
        p[f"ln{i}_b"] = jnp.zeros((1, d), jnp.float32)
    return p


def init_decoder_layer(key, d, ff, nhead):
    k1, k2, k3 = jax.random.split(key, 3)
    p = dict(**init_self_attn(k1, d, nhead), **init_cross_attn(k2, d, nhead),
             **_ffn_params(k3, d, ff))
    for i in (1, 2, 3):
        p[f"ln{i}_g"] = jnp.ones((1, d), jnp.float32)
        p[f"ln{i}_b"] = jnp.zeros((1, d), jnp.float32)
    return p


def init_transformer_params(key, d, ff, n_enc, n_dec, nhead):
    ks = jax.random.split(key, n_enc + n_dec)
    return dict(
        encoder_layers=[init_encoder_layer(ks[i], d, ff, nhead)
                        for i in range(n_enc)],
        decoder_layers=[init_decoder_layer(ks[n_enc + i], d, ff, nhead)
                        for i in range(n_dec)],
        dec_norm_g=jnp.ones((1, d), jnp.float32),
        dec_norm_b=jnp.zeros((1, d), jnp.float32),
    )


# ----------------------------------- main ----------------------------------- #

if __name__ == "__main__":
    d_model, nhead, dim_ff = 32, 4, 64
    n_enc, n_dec = 2, 2
    bs, h, w, num_queries = 2, 4, 4, 8

    key = jax.random.PRNGKey(0)
    k_params, k_src, k_pos, k_query = jax.random.split(key, 4)

    params = init_transformer_params(k_params, d_model, dim_ff, n_enc, n_dec, nhead)
    src = jax.random.normal(k_src, (bs, d_model, h, w), jnp.float32)        # NCHW
    pos_embed = jax.random.normal(k_pos, (bs, d_model, h, w), jnp.float32)  # NCHW
    query_embed = jax.random.normal(k_query, (num_queries, d_model), jnp.float32)

    hs = transformer_forward(src, None, query_embed, pos_embed, params, nhead)
    hs = jax.block_until_ready(hs)

    assert hs.shape == (1, bs, num_queries, d_model), hs.shape
    assert bool(jnp.all(jnp.isfinite(hs)))
    print("KERNEL_OK")
</pallas_src>

<mosaic_0001>
module attributes {stable_mosaic.version = 11 : i64} {
  func.func @_qkv_proj_kernel(%arg0: i32, %arg1: memref<32x32xf32, #tpu.memory_space<vmem>>, %arg2: memref<32x32xf32, #tpu.memory_space<vmem>>, %arg3: memref<32x64xbf16, #tpu.memory_space<vmem>>, %arg4: memref<1x64xf32, #tpu.memory_space<vmem>>, %arg5: memref<32x32xbf16, #tpu.memory_space<vmem>>, %arg6: memref<1x32xf32, #tpu.memory_space<vmem>>, %arg7: memref<32x32xf32, #tpu.memory_space<vmem>>, %arg8: memref<32x64xf32, #tpu.memory_space<vmem>>) attributes {dimension_semantics = [#tpu.dimension_semantics<parallel>], iteration_bounds = array<i64: 1>, scalar_prefetch = 0 : i64, scratch_operands = 0 : i64, tpu.core_type = #tpu.core_type<tc>, window_params = [{transform_indices = @transform_0, window_bounds = array<i64: 32, 32>}, {transform_indices = @transform_1, window_bounds = array<i64: 32, 32>}, {pipeline_mode = #tpu.pipeline_mode<synchronous>, transform_indices = @transform_2, window_bounds = array<i64: 32, 64>}, {pipeline_mode = #tpu.pipeline_mode<synchronous>, transform_indices = @transform_3, window_bounds = array<i64: 1, 64>}, {pipeline_mode = #tpu.pipeline_mode<synchronous>, transform_indices = @transform_4, window_bounds = array<i64: 32, 32>}, {pipeline_mode = #tpu.pipeline_mode<synchronous>, transform_indices = @transform_5, window_bounds = array<i64: 1, 32>}, {transform_indices = @transform_6, window_bounds = array<i64: 32, 32>}, {transform_indices = @transform_7, window_bounds = array<i64: 32, 64>}]} {
    %c0 = arith.constant 0 : index
    %c0_0 = arith.constant 0 : index
    %0 = vector.load %arg1[%c0, %c0_0] : memref<32x32xf32, #tpu.memory_space<vmem>>, vector<32x32xf32>
    %c0_1 = arith.constant 0 : index
    %c0_2 = arith.constant 0 : index
    %1 = vector.load %arg2[%c0_1, %c0_2] : memref<32x32xf32, #tpu.memory_space<vmem>>, vector<32x32xf32>
    %2 = arith.addf %0, %1 : vector<32x32xf32>
    %3 = arith.truncf %2 : vector<32x32xf32> to vector<32x32xbf16>
    %c0_3 = arith.constant 0 : index
    %c0_4 = arith.constant 0 : index
    %4 = vector.load %arg3[%c0_3, %c0_4] : memref<32x64xbf16, #tpu.memory_space<vmem>>, vector<32x64xbf16>
    %cst = arith.constant dense<0.000000e+00> : vector<32x64xf32>
    %5 = tpu.matmul %3, %4, %cst {dimension_numbers = #tpu.dot_dimension_numbers<[1], [0], [0], [1], [0, 0, 1, 1], [], []>} : vector<32x32xbf16>, vector<32x64xbf16>, vector<32x64xf32> -> vector<32x64xf32>
    %c0_5 = arith.constant 0 : index
    %c0_6 = arith.constant 0 : index
    %6 = vector.load %arg4[%c0_5, %c0_6] : memref<1x64xf32, #tpu.memory_space<vmem>>, vector<1x64xf32>
    %7 = vector.broadcast %6 : vector<1x64xf32> to vector<32x64xf32>
    %8 = arith.addf %5, %7 : vector<32x64xf32>
    %9 = arith.truncf %0 : vector<32x32xf32> to vector<32x32xbf16>
    %c0_7 = arith.constant 0 : index
    %c0_8 = arith.constant 0 : index
    %10 = vector.load %arg5[%c0_7, %c0_8] : memref<32x32xbf16, #tpu.memory_space<vmem>>, vector<32x32xbf16>
    %cst_9 = arith.constant dense<0.000000e+00> : vector<32x32xf32>
    %11 = tpu.matmul %9, %10, %cst_9 {dimension_numbers = #tpu.dot_dimension_numbers<[1], [0], [0], [1], [0, 0, 1, 1], [], []>} : vector<32x32xbf16>, vector<32x32xbf16>, vector<32x32xf32> -> vector<32x32xf32>
    %c0_10 = arith.constant 0 : index
    %c0_11 = arith.constant 0 : index
    %12 = vector.load %arg6[%c0_10, %c0_11] : memref<1x32xf32, #tpu.memory_space<vmem>>, vector<1x32xf32>
    %13 = vector.broadcast %12 : vector<1x32xf32> to vector<32x32xf32>
    %14 = arith.addf %11, %13 : vector<32x32xf32>
    %15 = vector.extract_strided_slice %8 {offsets = [0, 0], sizes = [32, 32], strides = [1, 1]} : vector<32x64xf32> to vector<32x32xf32>
    %c0_12 = arith.constant 0 : index
    %c0_13 = arith.constant 0 : index
    %16 = vector.load %arg7[%c0_12, %c0_13] : memref<32x32xf32, #tpu.memory_space<vmem>>, vector<32x32xf32>
    tpu.vector_store %arg7[%c0_12, %c0_13], %15 {strides = array<i32>} : memref<32x32xf32, #tpu.memory_space<vmem>>, vector<32x32xf32>,
    %17 = vector.extract_strided_slice %8 {offsets = [0, 32], sizes = [32, 32], strides = [1, 1]} : vector<32x64xf32> to vector<32x32xf32>
    %18 = tpu.concatenate %17, %14 in 1 : vector<32x32xf32>, vector<32x32xf32> -> vector<32x64xf32>
    %c0_14 = arith.constant 0 : index
    %c0_15 = arith.constant 0 : index
    %19 = vector.load %arg8[%c0_14, %c0_15] : memref<32x64xf32, #tpu.memory_space<vmem>>, vector<32x64xf32>
    tpu.vector_store %arg8[%c0_14, %c0_15], %18 {strides = array<i32>} : memref<32x64xf32, #tpu.memory_space<vmem>>, vector<32x64xf32>,
    return
  }
  func.func @transform_0(%arg0: i32) -> (i32, i32) {
    %c0_i32 = arith.constant 0 : i32
    %c0_i32_0 = arith.constant 0 : i32
    return %arg0, %c0_i32 : i32, i32
  }
  func.func @transform_1(%arg0: i32) -> (i32, i32) {
    %c0_i32 = arith.constant 0 : i32
    %c0_i32_0 = arith.constant 0 : i32
    return %arg0, %c0_i32 : i32, i32
  }
  func.func @transform_2(%arg0: i32) -> (i32, i32) {
    %c0_i32 = arith.constant 0 : i32
    %c0_i32_0 = arith.constant 0 : i32
    %c0_i32_1 = arith.constant 0 : i32
    return %c0_i32, %c0_i32_0 : i32, i32
  }
  func.func @transform_3(%arg0: i32) -> (i32, i32) {
    %c0_i32 = arith.constant 0 : i32
    %c0_i32_0 = arith.constant 0 : i32
    %c0_i32_1 = arith.constant 0 : i32
    return %c0_i32, %c0_i32_0 : i32, i32
  }
  func.func @transform_4(%arg0: i32) -> (i32, i32) {
    %c0_i32 = arith.constant 0 : i32
    %c0_i32_0 = arith.constant 0 : i32
    %c0_i32_1 = arith.constant 0 : i32
    return %c0_i32, %c0_i32_0 : i32, i32
  }
  func.func @transform_5(%arg0: i32) -> (i32, i32) {
    %c0_i32 = arith.constant 0 : i32
    %c0_i32_0 = arith.constant 0 : i32
    %c0_i32_1 = arith.constant 0 : i32
    return %c0_i32, %c0_i32_0 : i32, i32
  }
  func.func @transform_6(%arg0: i32) -> (i32, i32) {
    %c0_i32 = arith.constant 0 : i32
    %c0_i32_0 = arith.constant 0 : i32
    return %arg0, %c0_i32 : i32, i32
  }
  func.func @transform_7(%arg0: i32) -> (i32, i32) {
    %c0_i32 = arith.constant 0 : i32
    %c0_i32_0 = arith.constant 0 : i32
    return %arg0, %c0_i32 : i32, i32
  }
}

</mosaic_0001>

<bundles_post_ra>
// kernel: tpu_custom_call.1
= control target key start
LH: loop header
LB: loop body
LE: loop exit
PB: predicated region body
PF: predicated region fallthrough
CT: control target
= control target key end

     0   :  { %13 = vsyncpa [#allocation3], 0  ;;  %s624_s0 = inlined_call_operand.hbm [shape: f32[32,32], index: 0, kind: input, shape index: {}]   ;;  %s625_s1 = inlined_call_operand.hbm [shape: f32[32,32], index: 1, kind: input, shape index: {}]   ;;  %s626_s2 = inlined_call_operand.hbm [shape: bf16[32,64], index: 2, kind: input, shape index: {}]   ;;  %s627_s3 = inlined_call_operand.vmem [shape: f32[1,64], index: 3, kind: input, shape index: {}]   ;;  %s628_s4 = inlined_call_operand.hbm [shape: bf16[32,32], index: 4, kind: input, shape index: {}]   ;;  %s629_s5 = inlined_call_operand.vmem [shape: f32[1,32], index: 5, kind: input, shape index: {}]   ;;  %s630_s6 = inlined_call_operand.hbm [shape: f32[32,32], index: 6, kind: output, shape index: {0}]   ;;  %s631_s7 = inlined_call_operand.hbm [shape: f32[32,64], index: 7, kind: output, shape index: {1}]  }
   0x1   :  { %14 = vsyncpa [#allocation6], 0 }
   0x2   :  { %15 = vsyncpa [#allocation9], 0 }
   0x3   :  { %16 = vsyncpa [#allocation4], 0 }
   0x4   :  { %17 = vsyncpa [#allocation12], 0  ;;  %s516_s24 = smov [#allocation5]   ;;  %s517_s26 = smov [#allocation2]  }
   0x5   :  { %s35_s25 = sshll.u32 %s516_s24, 4  ;;  %s23_s27 = sshll.u32 %s517_s26, 4  ;;  %s36_s25 = int_to_ptr.vmem [resolvable:$true] %s35_s25  ;;  %s24_s27 = int_to_ptr.vmem [resolvable:$true] %s23_s27 }
   0x6   :  { %s394_s28 = scalar_lea.vmem %s36_s25, 512  ;;  %p399_p1 = scmp.lt.s32.totalorder %s36_s25, %s36_s25 }
   0x7   :  { %p395_p0 = scmp.ne.s32.totalorder %s36_s25, %s394_s28  ;;  %p400_p2 = scmp.lt.s32.totalorder %s394_s28, %s394_s28 }
   0x9   :  { %p401_p3 = por %p400_p2, %p399_p1 }
   0xb   :  { %p402_p4 = pnand %p401_p3, %p395_p0 }
   0xd   :  { %405 = shalt.err (!%p402_p4)
}
   0xe   :  { %s518_s29 = smov 128   ;;  %s519_s30 = smov 8  }
   0xf   :  { %41 = dma.hbm_to_vmem [thread:$0]  %s625_s1, 512, %s36_s25, [#allocation6], %s518_s29, %s518_s29, %s519_s30  }
  0x10   :  { %s414_s10 = scalar_lea.vmem %s24_s27, 512  ;;  %p419_p6 = scmp.lt.s32.totalorder %s24_s27, %s24_s27 }
  0x11   :  { %p415_p5 = scmp.ne.s32.totalorder %s24_s27, %s414_s10  ;;  %p420_p7 = scmp.lt.s32.totalorder %s414_s10, %s414_s10 }
  0x13   :  { %p421_p8 = por %p420_p7, %p419_p6 }
  0x15   :  { %p422_p9 = pnand %p421_p8, %p415_p5 }
  0x17   :  { %425 = shalt.err (!%p422_p9)
}
  0x18   :  { %29 = dma.hbm_to_vmem [thread:$0]  %s624_s0, 512, %s24_s27, [#allocation3], %s518_s29, %s518_s29, %s519_s30  }
  0x19   :  { %s520_s13 = smov [#allocation7]  }
  0x1a   :  { %s47_s14 = sshll.u32 %s520_s13, 4  ;;  %s48_s14 = int_to_ptr.vmem [resolvable:$true] %s47_s14 }
  0x1b   :  { %s434_s15 = scalar_lea.vmem %s48_s14, 256  ;;  %p439_p11 = scmp.lt.s32.totalorder %s48_s14, %s48_s14 }
  0x1c   :  { %p435_p10 = scmp.ne.s32.totalorder %s48_s14, %s434_s15  ;;  %p440_p12 = scmp.lt.s32.totalorder %s434_s15, %s434_s15 }
  0x1e   :  { %p441_p13 = por %p440_p12, %p439_p11 }
  0x20   :  { %p442_p0 = pnand %p441_p13, %p435_p10 }
  0x22   :  { %445 = shalt.err (!%p442_p0)
}
  0x23   :  { %s521_s1 = smov 64   ;;  %s522_s16 = smov 4  }
  0x24   :  { %53 = dma.hbm_to_vmem [thread:$0]  %s626_s2, 256, %s48_s14, [#allocation6], %s521_s1, %s521_s1, %s522_s16  }
  0x25   :  { %s523_s19 = smov [#allocation8]  }
  0x26   :  { %s61_s20 = sshll.u32 %s523_s19, 4  ;;  %s62_s20 = int_to_ptr.vmem [resolvable:$true] %s61_s20 }
  0x27   :  { %s454_s0 = scalar_lea.vmem %s62_s20, 256  ;;  %p459_p2 = scmp.lt.s32.totalorder %s62_s20, %s62_s20 }
  0x28   :  { %p455_p1 = scmp.ne.s32.totalorder %s62_s20, %s454_s0  ;;  %p460_p3 = scmp.lt.s32.totalorder %s454_s0, %s454_s0 }
  0x2a   :  { %p461_p4 = por %p460_p3, %p459_p2 }
  0x2c   :  { %p462_p5 = pnand %p461_p4, %p455_p1 }
  0x2e   :  { %465 = shalt.err (!%p462_p5)
}
  0x2f   :  { %67 = dma.hbm_to_vmem [thread:$0]  %s628_s4, 256, %s62_s20, [#allocation9], %s521_s1, %s521_s1, %s522_s16  }
  0x30   :  { %506 = dma.done.wait [#allocation3], 512  }
  0x31   :  { %507 = vsyncadd [#allocation3], 4294966784 }
  0x32   :  { %508 = dma.done.wait [#allocation6], 768  }
  0x33   :  { %509 = vsyncadd [#allocation6], 4294966528 }
  0x34   :  { %510 = dma.done.wait [#allocation9], 256  }
  0x35   :  { %511 = vsyncadd [#allocation9], 4294967040  ;;  %v382_v0 = vld [vmem:[#allocation7 + $0x8] sm:$0xff]   ;;  %v383_v1 = vld [vmem:[#allocation8 + $0x8] sm:$0xff]   ;;  %vm120_vm0 = vcmask 261120   ;;  %s524_s23 = smov 96  }
  0x36   :  { %354 = vmatprep.subr.bf16.mxu0 %v382_v0  ;;  %v384_v2 = vld [vmem:[#allocation7] sm:$0xff]   ;;  %362 = vmatprep.subr.bf16.mxu1 %v383_v1  ;;  %v385_v3 = vld [vmem:[#allocation8] sm:$0xff]   ;;  %v84_v5 = vld [vmem:[#allocation2 + $0x8] sm:$0xff]  ;;  %s525_s26 = smov [#allocation10]  }
  0x37   :  { %355 = vmatpush3.bf16.msra.mxu0 %v382_v0  ;;  %363 = vmatpush3.bf16.msra.mxu1 %v383_v1  ;;  %v83_v4 = vld [vmem:[#allocation2] sm:$0xff]  ;;  %v88_v7 = vld [vmem:[#allocation5 + $0x8] sm:$0xff]  ;;  %v85_v10 = vld [vmem:[#allocation2 + $0x10] sm:$0xff]  ;;  %s306_s27 = sshll.u32 %s525_s26, 4  ;;  %s307_s27 = int_to_ptr.vmem [resolvable:$true] %s306_s27 }
  0x38   :  { %356 = vmatprep.subr.bf16.mxu0 %v384_v2  ;;  %v87_v6 = vld [vmem:[#allocation5] sm:$0xff]  ;;  %364 = vmatprep.subr.bf16.mxu1 %v385_v3  ;;  %v176_v9 = vpack.c.bf16 %v84_v5, %v83_v4  ;;  %v86_v11 = vld [vmem:[#allocation2 + $0x18] sm:$0xff]  ;;  %v92_v12 = vadd.f32 %v88_v7, %v84_v5  ;;  %v89_v13 = vld [vmem:[#allocation5 + $0x10] sm:$0xff]  ;;  %p471_p7 = scmp.lt.s32.totalorder %s307_s27, %s307_s27 }
  0x39   :  { %v91_v8 = vadd.f32 %v87_v6, %v83_v4  ;;  %v90_v14 = vld [vmem:[#allocation5 + $0x18] sm:$0xff]  ;;  %v93_v15 = vadd.f32 %v89_v13, %v85_v10  ;;  %v177_v17 = vpack.c.bf16 %v86_v11, %v85_v10  ;;  %v336_v20 = vld [vmem:[%s627_s3] ss:$0 sm:$0xff]  ;;  %s526_s3 = smov 32  }
  0x3a   :  { %366 = vmatprep.mubr.msk.bf16.mxu1 %vm120_vm0, %v176_v9  ;;  %v94_v16 = vadd.f32 %v90_v14, %v86_v11  ;;  %v341_v27 = vld [vmem:[%s629_s5] ss:$0 sm:$0xff]  ;;  %s466_s5 = scalar_lea.vmem %s307_s27, 512 }
  0x3b   :  { %357 = vmatpush3.bf16.msra.mxu0 %v384_v2  ;;  %365 = vmatpush3.bf16.msra.mxu1 %v385_v3  ;;  %v95_v18 = vpack.c.bf16 %v92_v12, %v91_v8  ;;  %p467_p6 = scmp.ne.s32.totalorder %s307_s27, %s466_s5  ;;  %p472_p8 = scmp.lt.s32.totalorder %s466_s5, %s466_s5 }
  0x3c   :  { %v96_v19 = vpack.c.bf16 %v94_v16, %v93_v15 }
  0x3d   :  { %358 = vmatprep.mubr.msk.bf16.mxu0 %vm120_vm0, %v95_v18  ;;  %p473_p9 = por %p472_p8, %p471_p7 }
  0x3e   :  { %359 = vmatmul.mubr.msk.bf16.vlgmr.msra.gmra.mxu0 %vm120_vm0, %v96_v19  ;;  %367 = vmatmul.mubr.msk.bf16.vlgmr.msra.gmra.mxu1 %vm120_vm0, %v177_v17 }
  0x3f   :  { %p474_p10 = pnand %p473_p9, %p467_p6 }
  0xfe   :  { %v360_v21 = vpop.f32.mrf.mxu0  ;;  %v368_v22 = vpop.f32.mrf.mxu1 }
  0xff   :  { %v170_v23 = vadd.f32 %v360_v21, %v336_v20 }
 0x100   :  { %v161_v24 = vpop.f32.mrf.mxu0  ;;  %v241_v25 = vpop.f32.mrf.mxu1 }
 0x101   :  { %258 = vst.msk [vmem:[#allocation10 + $0x10] sm:$0xff] %vm120_vm0, %v170_v23  ;;  %v162_v26 = vadd.f32 %v336_v20, %v161_v24  ;;  %268 = vrot.lane.b32.xlu1 %v170_v23, %s524_s23  ;;  %v242_v33 = vadd.f32 %v341_v27, %v241_v25 }
 0x102   :  { %v361_v28 = vpop.f32.mrf.mxu0  ;;  %v369_v29 = vpop.f32.mrf.mxu1 }
 0x103   :  { %256 = vst.msk [vmem:[#allocation10] sm:$0xff] %vm120_vm0, %v162_v26  ;;  %v173_v30 = vadd.f32 %v361_v28, %v336_v20  ;;  %264 = vrot.lane.b32.xlu0 %v162_v26, %s524_s23 }
 0x104   :  { %v164_v31 = vpop.f32.mrf.mxu0  ;;  %v244_v32 = vpop.f32.mrf.mxu1 }
 0x105   :  { %259 = vst.msk [vmem:[#allocation10 + $0x18] sm:$0xff] %vm120_vm0, %v173_v30  ;;  %v165_v34 = vadd.f32 %v336_v20, %v164_v31  ;;  %270 = vrot.lane.b32.xlu1 %v173_v30, %s524_s23  ;;  %v245_v35 = vadd.f32 %v341_v27, %v244_v32 }
 0x107   :  { %257 = vst.msk [vmem:[#allocation10 + $0x8] sm:$0xff] %vm120_vm0, %v165_v34  ;;  %280 = vrot.lane.b32.xlu0 %v242_v33, %s526_s3 }
 0x108   :  { %477 = shalt.err (!%p474_p10)
}
 0x109   :  { %312 = dma.vmem_to_hbm [thread:$0]  %s307_s27, 512, %s630_s6, [#allocation4], %s518_s29, %s518_s29, %s519_s30   ;;  %v253_v36 = vadd.f32 %v369_v29, %v341_v27  ;;  %v250_v37 = vadd.f32 %v368_v22, %v341_v27  ;;  %vm296_vm1 = vcmask 523264  }
 0x10a   :  { %282 = vrot.lane.b32.xlu1 %v245_v35, %s526_s3  ;;  %s527_s6 = smov [#allocation11]  }
 0x10b   :  { %266 = vrot.lane.b32.xlu0 %v165_v34, %s524_s23  ;;  %s318_s9 = sshll.u32 %s527_s6, 4  ;;  %s319_s9 = int_to_ptr.vmem [resolvable:$true] %s318_s9 }
 0x10c   :  { %s486_s10 = scalar_lea.vmem %s319_s9, 512  ;;  %p491_p12 = scmp.lt.s32.totalorder %s319_s9, %s319_s9 }
 0x10d   :  { %p487_p11 = scmp.ne.s32.totalorder %s319_s9, %s486_s10  ;;  %p492_p13 = scmp.lt.s32.totalorder %s486_s10, %s486_s10 }
 0x10e   :  { %286 = vrot.lane.b32.xlu1 %v253_v36, %s526_s3 }
 0x10f   :  { %284 = vrot.lane.b32.xlu0 %v250_v37, %s526_s3  ;;  %p493_p0 = por %p492_p13, %p491_p12 }
 0x111   :  { %p494_p1 = pnand %p493_p0, %p487_p11 }
 0x173   :  { %v269_v38 = vpop.permute.xlu1 %268 }
 0x175   :  { %v265_v39 = vpop.permute.xlu0 %264 }
 0x177   :  { %v271_v40 = vpop.permute.xlu1 %270 }
 0x179   :  { %v281_v41 = vpop.permute.xlu0 %280 }
 0x17a   :  { %v292_v42 = vsel %vm120_vm0, %v265_v39, %v281_v41 }
 0x17b   :  { %297 = vst.msk [vmem:[#allocation11] sm:$0xff] %vm296_vm1, %v292_v42 }
 0x17c   :  { %v283_v43 = vpop.permute.xlu1 %282 }
 0x17d   :  { %v267_v44 = vpop.permute.xlu0 %266 }
 0x17e   :  { %v293_v45 = vsel %vm120_vm0, %v267_v44, %v283_v43 }
 0x17f   :  { %298 = vst.msk [vmem:[#allocation11 + $0x8] sm:$0xff] %vm296_vm1, %v293_v45 }
 0x180   :  { %v287_v46 = vpop.permute.xlu1 %286 }
 0x181   :  { %v295_v47 = vsel %vm120_vm0, %v271_v40, %v287_v46  ;;  %v285_v48 = vpop.permute.xlu0 %284 }
 0x182   :  { %300 = vst.msk [vmem:[#allocation11 + $0x18] sm:$0xff] %vm296_vm1, %v295_v47  ;;  %v294_v49 = vsel %vm120_vm0, %v269_v38, %v285_v48 }
 0x183   :  { %299 = vst.msk [vmem:[#allocation11 + $0x10] sm:$0xff] %vm296_vm1, %v294_v49 }
 0x184   :  { %497 = shalt.err (!%p494_p1)
}
 0x185   :  { %324 = dma.vmem_to_hbm [thread:$0]  %s319_s9, 512, %s631_s7, [#allocation12], %s518_s29, %s518_s29, %s519_s30  }
 0x186   :  { %512 = dma.done.wait [#allocation4], 512  }
 0x187   :  { %513 = vsyncadd [#allocation4], 4294966784 }
 0x188   :  { %514 = dma.done.wait [#allocation12], 512  }
 0x189   :  { %515 = vsyncadd [#allocation12], 4294966784 }
 0x18a   :  { %331 = vsyncpa [#allocation3], 1 }
 0x18b   :  { %332 = vsyncpa [#allocation6], 1 }
 0x18c   :  { %333 = vsyncpa [#allocation9], 1 }
 0x18d   :  { %334 = vsyncpa [#allocation4], 1 }
 0x18e   :  { %335 = vsyncpa [#allocation12], 1 }

</bundles_post_ra>
